<compile_context>
chip_gen: v7x
topology: tpu7x:2x2x1
jax: 0.10.0
libtpu: 0.0.40
codegen_flags: <defaults>
</compile_context>

<pallas_src>
import functools

import jax
import jax.numpy as jnp
from jax import lax
from jax.experimental import pallas as pl
from jax.experimental.pallas import tpu as pltpu


# ----------------------------------------------------------------------------
# Helpers
# ----------------------------------------------------------------------------
def _round_up(x, m):
    return ((x + m - 1) // m) * m


def _tpu_vmem_bytes():
    # Per-core VMEM capacity; fall back to the smallest (v7x per-TC) if the
    # query is unavailable.
    try:
        return int(pltpu.get_tpu_info().vmem_capacity_bytes)
    except Exception:  # noqa: BLE001 - best-effort hardware query
        return 64 << 20


def _resident(shape):
    # Full-array block with a constant block index: DMA'd once, then kept
    # VMEM-resident across all batch-grid steps.  Buffered(1): a constant
    # index_map gets no benefit from double-buffering, so a single buffer
    # halves the weight VMEM footprint.
    try:
        return pl.BlockSpec(shape, lambda i: (0, 0), pipeline_mode=pl.Buffered(1))
    except (TypeError, AttributeError):
        return pl.BlockSpec(shape, lambda i: (0, 0))


def _batch_tiling(batch):
    # Generation-aware row tile: 512 on 128 MiB-VMEM chips (v5e/v6e), 256 on
    # v7x (64 MiB/TC).  Split batches >8 rows into >=2 tiles so the parallel
    # batch grid can shard across the two v7x TensorCores.  Pad the batch so
    # every block is full (no edge masking).
    cap = 512 if _tpu_vmem_bytes() >= (96 << 20) else 256
    tb = _round_up(max(batch, 1), 8)
    if tb > 8:
        tb = _round_up(-(-tb // 2), 8)      # ceil(tb/2), sublane-aligned
    tb = min(tb, cap)
    b_pad = _round_up(batch, tb)
    return tb, b_pad


def _compiler_params(vmem_estimate_bytes):
    # Parallel batch axis -> megacore split on v7x (no-op on v5e/v6e).
    # VMEM limit tracks the chip generation: ~75% of physical per-core VMEM.
    cap = int(0.75 * _tpu_vmem_bytes())
    limit = int(min(cap, max(16 << 20, int(vmem_estimate_bytes))))
    return pltpu.CompilerParams(
        dimension_semantics=("parallel",),
        vmem_limit_bytes=limit,
    )


def _nbytes(*arrays):
    return int(sum(int(a.size) * a.dtype.itemsize for a in arrays))


# ----------------------------------------------------------------------------
# Kernels
# ----------------------------------------------------------------------------
def _shared_trunk(x_ref, w1_ref, b1_ref, w2_ref, b2_ref, dot_dtype):
    # x is already in dot_dtype (cast host-side).  f32 accumulation + f32
    # elementwise math (v5e has no bf16 VPU/EUP).
    x = x_ref[...]
    h = jnp.dot(x, w1_ref[...], preferred_element_type=jnp.float32) + b1_ref[...]
    h = jnp.maximum(h, 0.0)                                    # relu(shared1(x))
    h2 = jnp.dot(h.astype(dot_dtype), w2_ref[...],
                 preferred_element_type=jnp.float32) + b2_ref[...]
    return h + jnp.maximum(h2, 0.0)                            # h + relu(shared2(h))


def _translator_kernel(x_ref, w1_ref, b1_ref, w2_ref, b2_ref, w3_ref, b3_ref,
                       out_ref, *, w_thresh, dot_dtype):
    """Non-GMM forward: out = (w_thresh*tanh)(w_layer(shared path(x)))."""
    h = _shared_trunk(x_ref, w1_ref, b1_ref, w2_ref, b2_ref, dot_dtype)
    w = jnp.dot(h.astype(dot_dtype), w3_ref[...],
                preferred_element_type=jnp.float32) + b3_ref[...]
    if w_thresh is not None:
        w = w_thresh * jnp.tanh(w)
    out_ref[...] = w.astype(out_ref.dtype)


def _gmm_fused_head(h, w3c_ref, b3c_ref, *, w_thresh, dot_dtype, means_cols):
    # Fused w_layer + w_mixture_logits: one lane-dense MXU matmul.  Columns
    # [0, means_cols) are the (tanh-scaled) means, the next num_mixtures
    # columns are the raw mixture logits, the rest is zero padding.
    y = jnp.dot(h.astype(dot_dtype), w3c_ref[...],
                preferred_element_type=jnp.float32) + b3c_ref[...]
    tb, out_pad = y.shape
    col = lax.broadcasted_iota(jnp.int32, (tb, out_pad), 1)
    if w_thresh is not None:
        y = jnp.where(col < means_cols, w_thresh * jnp.tanh(y), y)
    return y, col


def _translator_gmm_nosample_kernel(x_ref, w1_ref, b1_ref, w2_ref, b2_ref,
                                    w3c_ref, b3c_ref, y_ref, *,
                                    w_thresh, dot_dtype, means_cols):
    """GMM forward, no_sample path: only the fused (means | logits) output."""
    h = _shared_trunk(x_ref, w1_ref, b1_ref, w2_ref, b2_ref, dot_dtype)
    y, _ = _gmm_fused_head(h, w3c_ref, b3c_ref, w_thresh=w_thresh,
                           dot_dtype=dot_dtype, means_cols=means_cols)
    y_ref[...] = y.astype(y_ref.dtype)


def _translator_gmm_select_kernel(x_ref, w1_ref, b1_ref, w2_ref, b2_ref,
                                  w3c_ref, b3c_ref, selmat_ref,
                                  y_ref, wsel_ref, *,
                                  w_thresh, dot_dtype, means_cols,
                                  num_mixtures, w_dim):
    """GMM forward, deterministic branch: fused output + argmax-selected means."""
    h = _shared_trunk(x_ref, w1_ref, b1_ref, w2_ref, b2_ref, dot_dtype)
    y, col = _gmm_fused_head(h, w3c_ref, b3c_ref, w_thresh=w_thresh,
                             dot_dtype=dot_dtype, means_cols=means_cols)
    y_ref[...] = y.astype(y_ref.dtype)

    # In-kernel deterministic argmax-select of the mixture component.
    is_logit = (col >= means_cols) & (col < means_cols + num_mixtures)
    logits_masked = jnp.where(is_logit, y, -jnp.inf)
    max_l = jnp.max(logits_masked, axis=1, keepdims=True)                 # (tb,1)
    cand = jnp.where(is_logit & (y == max_l), col - means_cols, num_mixtures)
    idx = jnp.min(cand, axis=1, keepdims=True)                 # first argmax in [0,M)
    lo = idx * w_dim
    sel_mask = (col >= lo) & (col < lo + w_dim)                # selected component cols
    masked = jnp.where(sel_mask, y, 0.0)
    # 0/1 selection matrix (f32) -> exact pick of the selected means block.
    w_sel = jnp.dot(masked, selmat_ref[...], preferred_element_type=jnp.float32)
    wsel_ref[...] = w_sel.astype(wsel_ref.dtype)


# ----------------------------------------------------------------------------
# Wrappers
# ----------------------------------------------------------------------------
def translator_forward(params, x, *, w_thresh, dot_dtype=jnp.bfloat16):
    """with_gmm=False path. x: (B, clip_dim) -> (B, w_dim)."""
    B, clip_dim = x.shape
    hid = params["w1"].shape[1]
    w_dim = params["w3"].shape[1]
    clip_pad = _round_up(clip_dim, 128)                        # lane-dense x / full MXU K
    out_pad = _round_up(w_dim, 128)                            # lane-dense output

    tb, b_pad = _batch_tiling(B)
    x_p = jnp.pad(x, ((0, b_pad - B), (0, clip_pad - clip_dim))).astype(dot_dtype)

    w1 = jnp.pad(params["w1"], ((0, clip_pad - clip_dim), (0, 0))).astype(dot_dtype)
    w2 = params["w2"].astype(dot_dtype)
    w3 = jnp.pad(params["w3"], ((0, 0), (0, out_pad - w_dim))).astype(dot_dtype)
    b1 = params["b1"].astype(jnp.float32)
    b2 = params["b2"].astype(jnp.float32)
    b3 = jnp.pad(params["b3"], ((0, 0), (0, out_pad - w_dim))).astype(jnp.float32)

    grid = (b_pad // tb,)
    in_specs = [
        pl.BlockSpec((tb, clip_pad), lambda i: (i, 0)),        # x: tiled over batch
        _resident(w1.shape), _resident(b1.shape),
        _resident(w2.shape), _resident(b2.shape),
        _resident(w3.shape), _resident(b3.shape),
    ]
    out_specs = pl.BlockSpec((tb, out_pad), lambda i: (i, 0))

    flops = 2 * b_pad * (clip_pad * hid + hid * hid + hid * out_pad)
    transc = b_pad * out_pad if w_thresh is not None else 0
    bytes_accessed = _nbytes(x_p, w1, b1, w2, b2, w3, b3) + b_pad * out_pad * 4
    vmem_est = (_nbytes(w1, b1, w2, b2, w3, b3)                # Buffered(1) weights
                + 2 * (tb * clip_pad * x_p.dtype.itemsize + tb * out_pad * 4)
                + 4 * 2 * tb * hid + (2 << 20))

    kernel = functools.partial(_translator_kernel, w_thresh=w_thresh,
                               dot_dtype=dot_dtype)
    out = pl.pallas_call(
        kernel,
        out_shape=jax.ShapeDtypeStruct((b_pad, out_pad), jnp.float32),
        grid=grid,
        in_specs=in_specs,
        out_specs=out_specs,
        compiler_params=_compiler_params(vmem_est),
        cost_estimate=pl.CostEstimate(flops=int(flops), transcendentals=int(transc),
                                      bytes_accessed=int(bytes_accessed)),
    )(x_p, w1, b1, w2, b2, w3, b3)
    return out[:B, :w_dim]


def translator_forward_gmm(params, x, *, w_thresh, num_mixtures, w_dim,
                           log_stds, min_std=1e-6, no_sample=False,
                           dot_dtype=jnp.bfloat16):
    """with_gmm=True path (no_sample / deterministic argmax-select branches)."""
    B, clip_dim = x.shape
    hid = params["w1"].shape[1]
    means_cols = num_mixtures * w_dim
    fused_cols = means_cols + num_mixtures
    clip_pad = _round_up(clip_dim, 128)
    out_pad = _round_up(fused_cols, 128)                       # fused, lane-dense

    tb, b_pad = _batch_tiling(B)
    x_p = jnp.pad(x, ((0, b_pad - B), (0, clip_pad - clip_dim))).astype(dot_dtype)

    # Fuse w_layer and w_mixture_logits into one wide matmul (host-side concat).
    w3c = jnp.concatenate([params["w3"], params["wm"]], axis=1)
    b3c = jnp.concatenate([params["b3"], params["bm"]], axis=1)
    w3c = jnp.pad(w3c, ((0, 0), (0, out_pad - fused_cols))).astype(dot_dtype)
    b3c = jnp.pad(b3c, ((0, 0), (0, out_pad - fused_cols))).astype(jnp.float32)
    w1 = jnp.pad(params["w1"], ((0, clip_pad - clip_dim), (0, 0))).astype(dot_dtype)
    w2 = params["w2"].astype(dot_dtype)
    b1 = params["b1"].astype(jnp.float32)
    b2 = params["b2"].astype(jnp.float32)

    grid = (b_pad // tb,)
    base_in_specs = [
        pl.BlockSpec((tb, clip_pad), lambda i: (i, 0)),
        _resident(w1.shape), _resident(b1.shape),
        _resident(w2.shape), _resident(b2.shape),
        _resident(w3c.shape), _resident(b3c.shape),
    ]
    y_spec = pl.BlockSpec((tb, out_pad), lambda i: (i, 0))
    flops_base = 2 * b_pad * (clip_pad * hid + hid * hid + hid * out_pad)
    transc = b_pad * out_pad if w_thresh is not None else 0

    if no_sample:
        # Specialized kernel: no selmat DMA, no argmax/select matmul, one output.
        bytes_accessed = _nbytes(x_p, w1, b1, w2, b2, w3c, b3c) + b_pad * out_pad * 4
        vmem_est = (_nbytes(w1, b1, w2, b2, w3c, b3c)
                    + 2 * (tb * clip_pad * x_p.dtype.itemsize + tb * out_pad * 4)
                    + 4 * 2 * tb * hid + (2 << 20))
        kernel = functools.partial(_translator_gmm_nosample_kernel,
                                   w_thresh=w_thresh, dot_dtype=dot_dtype,
                                   means_cols=means_cols)
        y = pl.pallas_call(
            kernel,
            out_shape=jax.ShapeDtypeStruct((b_pad, out_pad), jnp.float32),
            grid=grid,
            in_specs=base_in_specs,
            out_specs=y_spec,
            compiler_params=_compiler_params(vmem_est),
            cost_estimate=pl.CostEstimate(flops=int(flops_base),
                                          transcendentals=int(transc),
                                          bytes_accessed=int(bytes_accessed)),
        )(x_p, w1, b1, w2, b2, w3c, b3c)
        logits = y[:B, means_cols:fused_cols]
        w_means = y[:B, :means_cols].reshape(B, num_mixtures, w_dim)
        return logits, w_means

    # Deterministic branch: component selected in-kernel by argmax(logits).
    wsel_pad = _round_up(w_dim, 128)
    # Static 0/1 matrix mapping means column m*w_dim+d -> output column d.
    rows = jnp.arange(out_pad)
    cols = jnp.arange(wsel_pad)
    selmat = (((rows[:, None] % w_dim) == cols[None, :])
              & (rows[:, None] < means_cols)).astype(jnp.float32)

    in_specs = base_in_specs + [_resident(selmat.shape)]
    out_specs = (y_spec, pl.BlockSpec((tb, wsel_pad), lambda i: (i, 0)))

    flops = flops_base + 2 * b_pad * out_pad * wsel_pad
    bytes_accessed = (_nbytes(x_p, w1, b1, w2, b2, w3c, b3c, selmat)
                      + b_pad * (out_pad + wsel_pad) * 4)
    vmem_est = (_nbytes(w1, b1, w2, b2, w3c, b3c, selmat)
                + 2 * (tb * clip_pad * x_p.dtype.itemsize
                       + tb * (out_pad + wsel_pad) * 4)
                + 4 * 2 * tb * hid + (2 << 20))

    kernel = functools.partial(_translator_gmm_select_kernel, w_thresh=w_thresh,
                               dot_dtype=dot_dtype, means_cols=means_cols,
                               num_mixtures=num_mixtures, w_dim=w_dim)
    y, wsel = pl.pallas_call(
        kernel,
        out_shape=(
            jax.ShapeDtypeStruct((b_pad, out_pad), jnp.float32),
            jax.ShapeDtypeStruct((b_pad, wsel_pad), jnp.float32),
        ),
        grid=grid,
        in_specs=in_specs,
        out_specs=out_specs,
        compiler_params=_compiler_params(vmem_est),
        cost_estimate=pl.CostEstimate(flops=int(flops), transcendentals=int(transc),
                                      bytes_accessed=int(bytes_accessed)),
    )(x_p, w1, b1, w2, b2, w3c, b3c, selmat)

    logits = y[:B, means_cols:fused_cols]
    w_means = y[:B, :means_cols].reshape(B, num_mixtures, w_dim)
    w = wsel[:B, :w_dim]
    # Mixture parameters (the torch MixtureSameFamily object itself is not
    # constructed); w_stds broadcast to the module's expanded (B, M, w_dim).
    w_stds = jnp.broadcast_to(jnp.exp(log_stds) + min_std, (B, num_mixtures, w_dim))
    return (logits, w_means, w_stds), w


# ----------------------------------------------------------------------------
# Deterministic parameter init (synthetic; mirrors nn.Linear shapes)
# ----------------------------------------------------------------------------
def init_params(key, clip_dim, w_dim, num_mixtures=None):
    hid = 4 * clip_dim
    ks = jax.random.split(key, 8)

    def lin(kw, kb, fan_in, fan_out):
        bound = 1.0 / jnp.sqrt(fan_in)
        w = jax.random.uniform(kw, (fan_in, fan_out), jnp.float32, -bound, bound)
        b = jax.random.uniform(kb, (1, fan_out), jnp.float32, -bound, bound)
        return w, b

    p = {}
    p["w1"], p["b1"] = lin(ks[0], ks[1], clip_dim, hid)           # shared1
    p["w2"], p["b2"] = lin(ks[2], ks[3], hid, hid)                # shared2
    out_dim = w_dim if num_mixtures is None else num_mixtures * w_dim
    p["w3"], p["b3"] = lin(ks[4], ks[5], hid, out_dim)            # w_layer
    if num_mixtures is not None:
        p["wm"], p["bm"] = lin(ks[6], ks[7], hid, num_mixtures)   # w_mixture_logits
    return p


# ----------------------------------------------------------------------------
# Pure-JAX references for correctness checks
# ----------------------------------------------------------------------------
def ref_forward(params, x, *, w_thresh):
    h = jax.nn.relu(x @ params["w1"] + params["b1"])
    h = h + jax.nn.relu(h @ params["w2"] + params["b2"])
    w = h @ params["w3"] + params["b3"]
    if w_thresh is not None:
        w = w_thresh * jnp.tanh(w)
    return w


def ref_forward_gmm(params, x, *, w_thresh, num_mixtures, w_dim):
    h = jax.nn.relu(x @ params["w1"] + params["b1"])
    h = h + jax.nn.relu(h @ params["w2"] + params["b2"])
    w = h @ params["w3"] + params["b3"]
    if w_thresh is not None:
        w = w_thresh * jnp.tanh(w)
    logits = h @ params["wm"] + params["bm"]
    return logits, w.reshape(x.shape[0], num_mixtures, w_dim)


if __name__ == "__main__":
    # Small shapes consistent with the module: clip_dim=32 (hid=128), w_dim=32, batch=8.
    B, CLIP_DIM, W_DIM = 8, 32, 32
    W_THRESH = 2.0
    NUM_MIXTURES = 4

    key = jax.random.PRNGKey(0)
    k_x, k_p, k_pg = jax.random.split(key, 3)
    x = jax.random.normal(k_x, (B, CLIP_DIM), jnp.float32)

    # --- with_gmm=False path, f32 (tight tolerance) ---------------------------
    params = init_params(k_p, CLIP_DIM, W_DIM)
    w_ref = ref_forward(params, x, w_thresh=W_THRESH)
    w_out = jax.block_until_ready(
        translator_forward(params, x, w_thresh=W_THRESH, dot_dtype=jnp.float32))
    assert w_out.shape == (B, W_DIM)
    assert jnp.allclose(w_out, w_ref, atol=1e-5, rtol=1e-5)

    # --- with_gmm=False path, default bf16 dot operands (v6e/v7x MXU path) ----
    w_out_bf16 = jax.block_until_ready(
        translator_forward(params, x, w_thresh=W_THRESH))
    assert jnp.allclose(w_out_bf16, w_ref, atol=1e-1, rtol=0.0)

    # --- with_gmm=True, no_sample path (f32, specialized kernel) --------------
    params_g = init_params(k_pg, CLIP_DIM, W_DIM, num_mixtures=NUM_MIXTURES)
    log_stds = jnp.log(jnp.ones((1, 1, W_DIM), jnp.float32) * 0.01)
    logits, w_means = translator_forward_gmm(
        params_g, x, w_thresh=W_THRESH, num_mixtures=NUM_MIXTURES,
        w_dim=W_DIM, log_stds=log_stds, no_sample=True, dot_dtype=jnp.float32)
    jax.block_until_ready((logits, w_means))
    logits_ref, means_ref = ref_forward_gmm(
        params_g, x, w_thresh=W_THRESH, num_mixtures=NUM_MIXTURES, w_dim=W_DIM)
    assert logits.shape == (B, NUM_MIXTURES)
    assert w_means.shape == (B, NUM_MIXTURES, W_DIM)
    assert jnp.allclose(logits, logits_ref, atol=1e-5, rtol=1e-5)
    assert jnp.allclose(w_means, means_ref, atol=1e-5, rtol=1e-5)

    # --- with_gmm=True, deterministic (in-kernel argmax-select), f32 ----------
    (logits_k, w_means_k, w_stds_k), w_sel = translator_forward_gmm(
        params_g, x, w_thresh=W_THRESH, num_mixtures=NUM_MIXTURES,
        w_dim=W_DIM, log_stds=log_stds, no_sample=False, dot_dtype=jnp.float32)
    w_sel = jax.block_until_ready(w_sel)
    assert w_sel.shape == (B, W_DIM)
    assert jnp.allclose(logits_k, logits_ref, atol=1e-5, rtol=1e-5)
    assert jnp.allclose(w_means_k, means_ref, atol=1e-5, rtol=1e-5)
    idx = jnp.argmax(logits_k, axis=1)
    w_expect = jnp.take_along_axis(w_means_k, idx[:, None, None], axis=1)[:, 0, :]
    assert jnp.allclose(w_sel, w_expect, atol=1e-6, rtol=0.0)
    assert w_stds_k.shape == (B, NUM_MIXTURES, W_DIM)

    # --- with_gmm=True, deterministic path, default bf16 (self-consistent) ----
    (logits_b, w_means_b, _), w_sel_b = translator_forward_gmm(
        params_g, x, w_thresh=W_THRESH, num_mixtures=NUM_MIXTURES,
        w_dim=W_DIM, log_stds=log_stds, no_sample=False)
    w_sel_b = jax.block_until_ready(w_sel_b)
    idx_b = jnp.argmax(logits_b, axis=1)
    w_expect_b = jnp.take_along_axis(w_means_b, idx_b[:, None, None], axis=1)[:, 0, :]
    assert jnp.allclose(w_sel_b, w_expect_b, atol=1e-6, rtol=0.0)
    assert jnp.allclose(w_means_b, means_ref, atol=1e-1, rtol=0.0)

    print("KERNEL_OK")
</pallas_src>

<mosaic_0001>
module attributes {stable_mosaic.version = 11 : i64} {
  func.func @_translator_kernel(%arg0: i32, %arg1: memref<8x128xf32, #tpu.memory_space<vmem>>, %arg2: memref<128x128xf32, #tpu.memory_space<vmem>>, %arg3: memref<1x128xf32, #tpu.memory_space<vmem>>, %arg4: memref<128x128xf32, #tpu.memory_space<vmem>>, %arg5: memref<1x128xf32, #tpu.memory_space<vmem>>, %arg6: memref<128x128xf32, #tpu.memory_space<vmem>>, %arg7: memref<1x128xf32, #tpu.memory_space<vmem>>, %arg8: memref<8x128xf32, #tpu.memory_space<vmem>>) attributes {dimension_semantics = [#tpu.dimension_semantics<parallel>], iteration_bounds = array<i64: 1>, scalar_prefetch = 0 : i64, scratch_operands = 0 : i64, tpu.core_type = #tpu.core_type<tc>, window_params = [{transform_indices = @transform_0, window_bounds = array<i64: 8, 128>}, {pipeline_mode = #tpu.pipeline_mode<synchronous>, transform_indices = @transform_1, window_bounds = array<i64: 128, 128>}, {pipeline_mode = #tpu.pipeline_mode<synchronous>, transform_indices = @transform_2, window_bounds = array<i64: 1, 128>}, {pipeline_mode = #tpu.pipeline_mode<synchronous>, transform_indices = @transform_3, window_bounds = array<i64: 128, 128>}, {pipeline_mode = #tpu.pipeline_mode<synchronous>, transform_indices = @transform_4, window_bounds = array<i64: 1, 128>}, {pipeline_mode = #tpu.pipeline_mode<synchronous>, transform_indices = @transform_5, window_bounds = array<i64: 128, 128>}, {pipeline_mode = #tpu.pipeline_mode<synchronous>, transform_indices = @transform_6, window_bounds = array<i64: 1, 128>}, {transform_indices = @transform_7, window_bounds = array<i64: 8, 128>}]} {
    %c0 = arith.constant 0 : index
    %c0_0 = arith.constant 0 : index
    %0 = vector.load %arg1[%c0, %c0_0] : memref<8x128xf32, #tpu.memory_space<vmem>>, vector<8x128xf32>
    %c0_1 = arith.constant 0 : index
    %c0_2 = arith.constant 0 : index
    %1 = vector.load %arg2[%c0_1, %c0_2] : memref<128x128xf32, #tpu.memory_space<vmem>>, vector<128x128xf32>
    %cst = arith.constant dense<0.000000e+00> : vector<8x128xf32>
    %2 = tpu.matmul %0, %1, %cst {dimension_numbers = #tpu.dot_dimension_numbers<[1], [0], [0], [1], [0, 0, 1, 1], [], []>} : vector<8x128xf32>, vector<128x128xf32>, vector<8x128xf32> -> vector<8x128xf32>
    %c0_3 = arith.constant 0 : index
    %c0_4 = arith.constant 0 : index
    %3 = vector.load %arg3[%c0_3, %c0_4] : memref<1x128xf32, #tpu.memory_space<vmem>>, vector<1x128xf32>
    %4 = vector.broadcast %3 : vector<1x128xf32> to vector<8x128xf32>
    %5 = arith.addf %2, %4 : vector<8x128xf32>
    %cst_5 = arith.constant 0.000000e+00 : f32
    %6 = vector.broadcast %cst_5 : f32 to vector<8x128xf32>
    %7 = arith.maximumf %5, %6 : vector<8x128xf32>
    %c0_6 = arith.constant 0 : index
    %c0_7 = arith.constant 0 : index
    %8 = vector.load %arg4[%c0_6, %c0_7] : memref<128x128xf32, #tpu.memory_space<vmem>>, vector<128x128xf32>
    %cst_8 = arith.constant dense<0.000000e+00> : vector<8x128xf32>
    %9 = tpu.matmul %7, %8, %cst_8 {dimension_numbers = #tpu.dot_dimension_numbers<[1], [0], [0], [1], [0, 0, 1, 1], [], []>} : vector<8x128xf32>, vector<128x128xf32>, vector<8x128xf32> -> vector<8x128xf32>
    %c0_9 = arith.constant 0 : index
    %c0_10 = arith.constant 0 : index
    %10 = vector.load %arg5[%c0_9, %c0_10] : memref<1x128xf32, #tpu.memory_space<vmem>>, vector<1x128xf32>
    %11 = vector.broadcast %10 : vector<1x128xf32> to vector<8x128xf32>
    %12 = arith.addf %9, %11 : vector<8x128xf32>
    %cst_11 = arith.constant 0.000000e+00 : f32
    %13 = vector.broadcast %cst_11 : f32 to vector<8x128xf32>
    %14 = arith.maximumf %12, %13 : vector<8x128xf32>
    %15 = arith.addf %7, %14 : vector<8x128xf32>
    %c0_12 = arith.constant 0 : index
    %c0_13 = arith.constant 0 : index
    %16 = vector.load %arg6[%c0_12, %c0_13] : memref<128x128xf32, #tpu.memory_space<vmem>>, vector<128x128xf32>
    %cst_14 = arith.constant dense<0.000000e+00> : vector<8x128xf32>
    %17 = tpu.matmul %15, %16, %cst_14 {dimension_numbers = #tpu.dot_dimension_numbers<[1], [0], [0], [1], [0, 0, 1, 1], [], []>} : vector<8x128xf32>, vector<128x128xf32>, vector<8x128xf32> -> vector<8x128xf32>
    %c0_15 = arith.constant 0 : index
    %c0_16 = arith.constant 0 : index
    %18 = vector.load %arg7[%c0_15, %c0_16] : memref<1x128xf32, #tpu.memory_space<vmem>>, vector<1x128xf32>
    %19 = vector.broadcast %18 : vector<1x128xf32> to vector<8x128xf32>
    %20 = arith.addf %17, %19 : vector<8x128xf32>
    %21 = math.tanh %20 : vector<8x128xf32>
    %cst_17 = arith.constant 2.000000e+00 : f32
    %22 = vector.broadcast %cst_17 : f32 to vector<8x128xf32>
    %23 = arith.mulf %22, %21 : vector<8x128xf32>
    %c0_18 = arith.constant 0 : index
    %c0_19 = arith.constant 0 : index
    %24 = vector.load %arg8[%c0_18, %c0_19] : memref<8x128xf32, #tpu.memory_space<vmem>>, vector<8x128xf32>
    tpu.vector_store %arg8[%c0_18, %c0_19], %23 {strides = array<i32>} : memref<8x128xf32, #tpu.memory_space<vmem>>, vector<8x128xf32>,
    return
  }
  func.func @transform_0(%arg0: i32) -> (i32, i32) {
    %c0_i32 = arith.constant 0 : i32
    %c0_i32_0 = arith.constant 0 : i32
    return %arg0, %c0_i32 : i32, i32
  }
  func.func @transform_1(%arg0: i32) -> (i32, i32) {
    %c0_i32 = arith.constant 0 : i32
    %c0_i32_0 = arith.constant 0 : i32
    %c0_i32_1 = arith.constant 0 : i32
    return %c0_i32, %c0_i32_0 : i32, i32
  }
  func.func @transform_2(%arg0: i32) -> (i32, i32) {
    %c0_i32 = arith.constant 0 : i32
    %c0_i32_0 = arith.constant 0 : i32
    %c0_i32_1 = arith.constant 0 : i32
    return %c0_i32, %c0_i32_0 : i32, i32
  }
  func.func @transform_3(%arg0: i32) -> (i32, i32) {
    %c0_i32 = arith.constant 0 : i32
    %c0_i32_0 = arith.constant 0 : i32
    %c0_i32_1 = arith.constant 0 : i32
    return %c0_i32, %c0_i32_0 : i32, i32
  }
  func.func @transform_4(%arg0: i32) -> (i32, i32) {
    %c0_i32 = arith.constant 0 : i32
    %c0_i32_0 = arith.constant 0 : i32
    %c0_i32_1 = arith.constant 0 : i32
    return %c0_i32, %c0_i32_0 : i32, i32
  }
  func.func @transform_5(%arg0: i32) -> (i32, i32) {
    %c0_i32 = arith.constant 0 : i32
    %c0_i32_0 = arith.constant 0 : i32
    %c0_i32_1 = arith.constant 0 : i32
    return %c0_i32, %c0_i32_0 : i32, i32
  }
  func.func @transform_6(%arg0: i32) -> (i32, i32) {
    %c0_i32 = arith.constant 0 : i32
    %c0_i32_0 = arith.constant 0 : i32
    %c0_i32_1 = arith.constant 0 : i32
    return %c0_i32, %c0_i32_0 : i32, i32
  }
  func.func @transform_7(%arg0: i32) -> (i32, i32) {
    %c0_i32 = arith.constant 0 : i32
    %c0_i32_0 = arith.constant 0 : i32
    return %arg0, %c0_i32 : i32, i32
  }
}

</mosaic_0001>

<bundles_post_ra>
// kernel: tpu_custom_call.1
= control target key start
LH: loop header
LB: loop body
LE: loop exit
PB: predicated region body
PF: predicated region fallthrough
CT: control target
= control target key end

     0   :  { %12 = vsyncpa [#allocation3], 0  ;;  %s902_s0 = inlined_call_operand.hbm [shape: f32[8,128], index: 0, kind: input, shape index: {}]   ;;  %s903_s1 = inlined_call_operand.hbm [shape: f32[128,128], index: 1, kind: input, shape index: {}]   ;;  %s904_s2 = inlined_call_operand.vmem [shape: f32[1,128], index: 2, kind: input, shape index: {}]   ;;  %s905_s3 = inlined_call_operand.hbm [shape: f32[128,128], index: 3, kind: input, shape index: {}]   ;;  %s906_s4 = inlined_call_operand.vmem [shape: f32[1,128], index: 4, kind: input, shape index: {}]   ;;  %s907_s5 = inlined_call_operand.hbm [shape: f32[128,128], index: 5, kind: input, shape index: {}]   ;;  %s908_s6 = inlined_call_operand.vmem [shape: f32[1,128], index: 6, kind: input, shape index: {}]   ;;  %s909_s7 = inlined_call_operand.hbm [shape: f32[8,128], index: 7, kind: output, shape index: {}]  }
   0x1   :  { %13 = vsyncpa [#allocation6], 0 }
   0x2   :  { %14 = vsyncpa [#allocation9], 0 }
   0x3   :  { %15 = vsyncpa [#allocation4], 0  ;;  %s744_s24 = smov [#allocation5]   ;;  %s626_s28 = scalar_lea.hbm %s903_s1, 2048 }
   0x4   :  { %s31_s25 = sshll.u32 %s744_s24, 4  ;;  %p627_p0 = scmp.ne.s32.totalorder %s903_s1, %s626_s28  ;;  %s32_s25 = int_to_ptr.vmem [resolvable:$true] %s31_s25 }
   0x5   :  { %p630_p1 = scmp.lt.u32.totalorder %s626_s28, %s903_s1 }
   0x7   :  { %p632_p2 = pnand %p630_p1, %p627_p0 }
   0x9   :  { %635 = shalt.err (!%p632_p2)
}
   0xa   :  { %s636_s10 = scalar_lea.vmem %s32_s25, 2048  ;;  %p641_p4 = scmp.lt.s32.totalorder %s32_s25, %s32_s25 }
   0xb   :  { %p637_p3 = scmp.ne.s32.totalorder %s32_s25, %s636_s10  ;;  %p642_p5 = scmp.lt.s32.totalorder %s636_s10, %s636_s10 }
   0xd   :  { %p643_p6 = por %p642_p5, %p641_p4 }
   0xf   :  { %p644_p7 = pnand %p643_p6, %p637_p3 }
  0x11   :  { %647 = shalt.err (!%p644_p7)
}
  0x12   :  { %s745_s11 = smov 128   ;;  %s746_s12 = smov 8  }
  0x13   :  { %37 = dma.hbm_to_vmem [thread:$0]  %s903_s1, 2048, %s32_s25, [#allocation6], %s745_s11, %s745_s11, %s746_s12  }
  0x14   :  { %s747_s15 = smov [#allocation2]   ;;  %s748_s17 = smov [#allocation7]  }
  0x15   :  { %s22_s16 = sshll.u32 %s747_s15, 4  ;;  %s45_s18 = sshll.u32 %s748_s17, 4  ;;  %s23_s16 = int_to_ptr.vmem [resolvable:$true] %s22_s16  ;;  %s46_s18 = int_to_ptr.vmem [resolvable:$true] %s45_s18 }
  0x16   :  { %s648_s21 = scalar_lea.hbm %s902_s0, 128 }
  0x17   :  { %p649_p8 = scmp.ne.s32.totalorder %s902_s0, %s648_s21  ;;  %p652_p9 = scmp.lt.u32.totalorder %s648_s21, %s902_s0 }
  0x19   :  { %p654_p10 = pnand %p652_p9, %p649_p8 }
  0x1b   :  { %657 = shalt.err (!%p654_p10)
}
  0x1c   :  { %s658_s1 = scalar_lea.vmem %s23_s16, 128  ;;  %p663_p12 = scmp.lt.s32.totalorder %s23_s16, %s23_s16 }
  0x1d   :  { %p659_p11 = scmp.ne.s32.totalorder %s23_s16, %s658_s1  ;;  %p664_p13 = scmp.lt.s32.totalorder %s658_s1, %s658_s1 }
  0x1f   :  { %p665_p0 = por %p664_p13, %p663_p12 }
  0x21   :  { %p666_p1 = pnand %p665_p0, %p659_p11 }
  0x23   :  { %669 = shalt.err (!%p666_p1)
}
  0x24   :  { %25 = dma.hbm_to_vmem [thread:$0]  %s902_s0, 128, %s23_s16, [#allocation3]  }
  0x25   :  { %s670_s30 = scalar_lea.hbm %s905_s3, 2048 }
  0x26   :  { %p671_p2 = scmp.ne.s32.totalorder %s905_s3, %s670_s30  ;;  %p674_p3 = scmp.lt.u32.totalorder %s670_s30, %s905_s3 }
  0x28   :  { %p676_p4 = pnand %p674_p3, %p671_p2 }
  0x2a   :  { %679 = shalt.err (!%p676_p4)
}
  0x2b   :  { %s680_s14 = scalar_lea.vmem %s46_s18, 2048  ;;  %p685_p6 = scmp.lt.s32.totalorder %s46_s18, %s46_s18 }
  0x2c   :  { %p681_p5 = scmp.ne.s32.totalorder %s46_s18, %s680_s14  ;;  %p686_p7 = scmp.lt.s32.totalorder %s680_s14, %s680_s14 }
  0x2e   :  { %p687_p8 = por %p686_p7, %p685_p6 }
  0x30   :  { %p688_p9 = pnand %p687_p8, %p681_p5 }
  0x32   :  { %691 = shalt.err (!%p688_p9)
}
  0x33   :  { %51 = dma.hbm_to_vmem [thread:$0]  %s905_s3, 2048, %s46_s18, [#allocation6], %s745_s11, %s745_s11, %s746_s12  }
  0x34   :  { %s749_s16 = smov [#allocation8]   ;;  %s692_s21 = scalar_lea.hbm %s907_s5, 2048 }
  0x35   :  { %s59_s17 = sshll.u32 %s749_s16, 4  ;;  %p693_p10 = scmp.ne.s32.totalorder %s907_s5, %s692_s21  ;;  %s60_s17 = int_to_ptr.vmem [resolvable:$true] %s59_s17 }
  0x36   :  { %p696_p11 = scmp.lt.u32.totalorder %s692_s21, %s907_s5 }
  0x38   :  { %p698_p12 = pnand %p696_p11, %p693_p10 }
  0x3a   :  { %701 = shalt.err (!%p698_p12)
}
  0x3b   :  { %s702_s1 = scalar_lea.vmem %s60_s17, 2048  ;;  %p707_p0 = scmp.lt.s32.totalorder %s60_s17, %s60_s17 }
  0x3c   :  { %p703_p13 = scmp.ne.s32.totalorder %s60_s17, %s702_s1  ;;  %p708_p1 = scmp.lt.s32.totalorder %s702_s1, %s702_s1 }
  0x3e   :  { %p709_p2 = por %p708_p1, %p707_p0 }
  0x40   :  { %p710_p3 = pnand %p709_p2, %p703_p13 }
  0x42   :  { %713 = shalt.err (!%p710_p3)
}
  0x43   :  { %65 = dma.hbm_to_vmem [thread:$0]  %s907_s5, 2048, %s60_s17, [#allocation9], %s745_s11, %s745_s11, %s746_s12  }
  0x44   :  { %736 = dma.done.wait [#allocation3], 128  }
  0x45   :  { %737 = vsyncadd [#allocation3], 4294967168 }
  0x46   :  { %738 = dma.done.wait [#allocation6], 4096  }
  0x47   :  { %739 = vsyncadd [#allocation6], 4294963200 }
  0x48   :  { %740 = dma.done.wait [#allocation9], 2048  }
  0x49   :  { %741 = vsyncadd [#allocation9], 4294965248  ;;  %v750_v0 = vmov 0.0|0.0   ;;  %vm751_vm0 = vmmov 0   ;;  %v752_v1 = vmov 0.0   ;;  %v81_v2 = vld [vmem:[#allocation5] sm:$0xff] }
  0x4a   :  { %542 = vmatprep.subr.bf16.mxu0 %v750_v0  ;;  %469 = vmatprep.mubr.msk.f32.mxu0 %vm751_vm0, %v752_v1  ;;  %v82_v3 = vld [vmem:[#allocation5 + $0x8] sm:$0xff]  ;;  %v83_v4 = vld [vmem:[#allocation5 + $0x10] sm:$0xff]  ;;  %v84_v6 = vld [vmem:[#allocation5 + $0x18] sm:$0xff]  ;;  %s753_s28 = smov [#allocation10]  }
  0x4b   :  { %566 = vmatprep.subr.bf16.mxu1 %v750_v0  ;;  %504 = vmatprep.mubr.msk.f32.mxu1 %vm751_vm0, %v752_v1  ;;  %v543_v5 = vpack.c.bf16 %v82_v3, %v81_v2  ;;  %v546_v7 = vpack.c.bf16 %v84_v6, %v83_v4  ;;  %v85_v8 = vld [vmem:[#allocation5 + $0x20] sm:$0xff]  ;;  %v86_v9 = vld [vmem:[#allocation5 + $0x28] sm:$0xff]  ;;  %v177_v12 = vld [vmem:[#allocation7 + $0x10] sm:$0xff]  ;;  %s372_s29 = sshll.u32 %s753_s28, 4  ;;  %s373_s29 = int_to_ptr.vmem [resolvable:$true] %s372_s29 }
  0x4c   :  { %v175_v10 = vld [vmem:[#allocation7] sm:$0xff]  ;;  %v176_v11 = vld [vmem:[#allocation7 + $0x8] sm:$0xff]  ;;  %v178_v13 = vld [vmem:[#allocation7 + $0x18] sm:$0xff]  ;;  %v549_v14 = vpack.c.bf16 %v86_v9, %v85_v8  ;;  %p719_p5 = scmp.lt.s32.totalorder %s373_s29, %s373_s29 }
  0x4d   :  { %544 = vmatpush3.bf16.msra.mxu0 %v543_v5  ;;  %v567_v15 = vpack.c.bf16 %v176_v11, %v175_v10  ;;  %v87_v16 = vld [vmem:[#allocation5 + $0x30] sm:$0xff]  ;;  %v88_v17 = vld [vmem:[#allocation5 + $0x38] sm:$0xff]  ;;  %v570_v18 = vpack.c.bf16 %v178_v13, %v177_v12  ;;  %v179_v19 = vld [vmem:[#allocation7 + $0x20] sm:$0xff] }
  0x4e   :  { %545 = vmatprep.subr.bf16.mxu0 %v750_v0  ;;  %v180_v20 = vld [vmem:[#allocation7 + $0x28] sm:$0xff]  ;;  %v552_v21 = vpack.c.bf16 %v88_v17, %v87_v16  ;;  %v89_v22 = vld [vmem:[#allocation5 + $0x40] sm:$0xff]  ;;  %v181_v25 = vld [vmem:[#allocation7 + $0x30] sm:$0xff] }
  0x4f   :  { %568 = vmatpush3.bf16.msra.mxu1 %v567_v15  ;;  %v90_v23 = vld [vmem:[#allocation5 + $0x48] sm:$0xff]  ;;  %v573_v24 = vpack.c.bf16 %v180_v20, %v179_v19  ;;  %v182_v26 = vld [vmem:[#allocation7 + $0x38] sm:$0xff]  ;;  %v91_v28 = vld [vmem:[#allocation5 + $0x50] sm:$0xff] }
  0x50   :  { %569 = vmatprep.subr.bf16.mxu1 %v750_v0  ;;  %v555_v27 = vpack.c.bf16 %v90_v23, %v89_v22  ;;  %v92_v29 = vld [vmem:[#allocation5 + $0x58] sm:$0xff]  ;;  %v576_v30 = vpack.c.bf16 %v182_v26, %v181_v25  ;;  %v183_v31 = vld [vmem:[#allocation7 + $0x40] sm:$0xff]  ;;  %v184_v32 = vld [vmem:[#allocation7 + $0x48] sm:$0xff] }
  0x51   :  { %547 = vmatpush3.bf16.msra.mxu0 %v546_v7  ;;  %v558_v33 = vpack.c.bf16 %v92_v29, %v91_v28  ;;  %v93_v34 = vld [vmem:[#allocation5 + $0x60] sm:$0xff]  ;;  %v94_v35 = vld [vmem:[#allocation5 + $0x68] sm:$0xff]  ;;  %v579_v36 = vpack.c.bf16 %v184_v32, %v183_v31  ;;  %v185_v37 = vld [vmem:[#allocation7 + $0x50] sm:$0xff] }
  0x52   :  { %548 = vmatprep.subr.bf16.mxu0 %v750_v0  ;;  %v186_v38 = vld [vmem:[#allocation7 + $0x58] sm:$0xff]  ;;  %v561_v39 = vpack.c.bf16 %v94_v35, %v93_v34  ;;  %v95_v40 = vld [vmem:[#allocation5 + $0x70] sm:$0xff]  ;;  %v187_v43 = vld [vmem:[#allocation7 + $0x60] sm:$0xff] }
  0x53   :  { %571 = vmatpush3.bf16.msra.mxu1 %v570_v18  ;;  %v96_v41 = vld [vmem:[#allocation5 + $0x78] sm:$0xff]  ;;  %v582_v42 = vpack.c.bf16 %v186_v38, %v185_v37  ;;  %v188_v44 = vld [vmem:[#allocation7 + $0x68] sm:$0xff]  ;;  %v189_v48 = vld [vmem:[#allocation7 + $0x70] sm:$0xff] }
  0x54   :  { %572 = vmatprep.subr.bf16.mxu1 %v750_v0  ;;  %v564_v45 = vpack.c.bf16 %v96_v41, %v95_v40  ;;  %v585_v46 = vpack.c.bf16 %v188_v44, %v187_v43  ;;  %v80_v47 = vld [vmem:[#allocation2] sm:$0xff]  ;;  %v270_v51 = vld [vmem:[#allocation8] sm:$0xff]  ;;  %v271_v52 = vld [vmem:[#allocation8 + $0x8] sm:$0xff] }
  0x55   :  { %550 = vmatpush3.bf16.msra.mxu0 %v549_v14  ;;  %v190_v49 = vld [vmem:[#allocation7 + $0x78] sm:$0xff]  ;;  %v272_v53 = vld [vmem:[#allocation8 + $0x10] sm:$0xff]  ;;  %v591_v54 = vpack.c.bf16 %v271_v52, %v270_v51  ;;  %v274_v57 = vld [vmem:[#allocation8 + $0x20] sm:$0xff] }
  0x56   :  { %551 = vmatprep.subr.bf16.mxu0 %v750_v0  ;;  %v588_v50 = vpack.c.bf16 %v190_v49, %v189_v48  ;;  %v273_v55 = vld [vmem:[#allocation8 + $0x18] sm:$0xff]  ;;  %v275_v58 = vld [vmem:[#allocation8 + $0x28] sm:$0xff]  ;;  %v276_v60 = vld [vmem:[#allocation8 + $0x30] sm:$0xff] }
  0x57   :  { %574 = vmatpush3.bf16.msra.mxu1 %v573_v24  ;;  %v594_v56 = vpack.c.bf16 %v273_v55, %v272_v53  ;;  %v597_v59 = vpack.c.bf16 %v275_v58, %v274_v57  ;;  %v277_v61 = vld [vmem:[#allocation8 + $0x38] sm:$0xff]  ;;  %v278_v63 = vld [vmem:[#allocation8 + $0x40] sm:$0xff]  ;;  %v280_v3 = vld [vmem:[#allocation8 + $0x50] sm:$0xff] }
  0x58   :  { %575 = vmatprep.subr.bf16.mxu1 %v750_v0  ;;  %v600_v62 = vpack.c.bf16 %v277_v61, %v276_v60  ;;  %v281_v4 = vld [vmem:[#allocation8 + $0x58] sm:$0xff]  ;;  %v282_v11 = vld [vmem:[#allocation8 + $0x60] sm:$0xff]  ;;  %v283_v12 = vld [vmem:[#allocation8 + $0x68] sm:$0xff] }
  0x59   :  { %553 = vmatpush3.bf16.msra.mxu0 %v552_v21  ;;  %v606_v5 = vpack.c.bf16 %v281_v4, %v280_v3  ;;  %v383_v6 = vld [vmem:[%s904_s2] ss:$0 sm:$0xff]  ;;  %v609_v13 = vpack.c.bf16 %v283_v12, %v282_v11  ;;  %v284_v14 = vld [vmem:[#allocation8 + $0x70] sm:$0xff] }
  0x5a   :  { %554 = vmatprep.subr.bf16.mxu0 %v750_v0  ;;  %v285_v15 = vld [vmem:[#allocation8 + $0x78] sm:$0xff] }
  0x5b   :  { %577 = vmatpush3.bf16.msra.mxu1 %v576_v30  ;;  %v612_v16 = vpack.c.bf16 %v285_v15, %v284_v14  ;;  %v384_v17 = vld [vmem:[%s906_s4] ss:$0 sm:$0xff]  ;;  %s714_s4 = scalar_lea.vmem %s373_s29, 128 }
  0x5c   :  { %578 = vmatprep.subr.bf16.mxu1 %v750_v0  ;;  %v385_v23 = vld [vmem:[%s908_s6] ss:$0 sm:$0xff]  ;;  %p715_p4 = scmp.ne.s32.totalorder %s373_s29, %s714_s4  ;;  %p720_p6 = scmp.lt.s32.totalorder %s714_s4, %s714_s4 }
  0x5d   :  { %556 = vmatpush3.bf16.msra.mxu0 %v555_v27 }
  0x5e   :  { %557 = vmatprep.subr.bf16.mxu0 %v750_v0  ;;  %p721_p7 = por %p720_p6, %p719_p5 }
  0x5f   :  { %580 = vmatpush3.bf16.msra.mxu1 %v579_v36 }
  0x60   :  { %581 = vmatprep.subr.bf16.mxu1 %v750_v0  ;;  %p722_p8 = pnand %p721_p7, %p715_p4 }
  0x61   :  { %559 = vmatpush3.bf16.msra.mxu0 %v558_v33 }
  0x62   :  { %560 = vmatprep.subr.bf16.mxu0 %v750_v0 }
  0x63   :  { %583 = vmatpush3.bf16.msra.mxu1 %v582_v42 }
  0x64   :  { %584 = vmatprep.subr.bf16.mxu1 %v750_v0 }
  0x65   :  { %562 = vmatpush3.bf16.msra.mxu0 %v561_v39 }
  0x66   :  { %563 = vmatprep.subr.bf16.mxu0 %v750_v0 }
  0x67   :  { %586 = vmatpush3.bf16.msra.mxu1 %v585_v46 }
  0x68   :  { %587 = vmatprep.subr.bf16.mxu1 %v750_v0 }
  0x69   :  { %565 = vmatpush3.bf16.msra.mxu0 %v564_v45 }
  0x6a   :  { %590 = vmatprep.subr.bf16.mxu0 %v750_v0 }
  0x6b   :  { %589 = vmatpush3.bf16.msra.mxu1 %v588_v50 }
  0x6c   :  { %470 = vmatmul.mubr.f32.vlgmr.msra.gmra.mrb[0].mxu0 %v80_v47 }
  0x6d   :  { %539 = vmatprep.mubr.msk.f32.mxu0 %vm751_vm0, %v752_v1  ;;  %592 = vmatpush3.bf16.msra.mxu0 %v591_v54  ;;  %v279_v1 = vld [vmem:[#allocation8 + $0x48] sm:$0xff] }
  0x6e   :  { %593 = vmatprep.subr.bf16.mxu0 %v750_v0  ;;  %v603_v2 = vpack.c.bf16 %v279_v1, %v278_v63 }
  0x71   :  { %595 = vmatpush3.bf16.msra.mxu0 %v594_v56 }
  0x72   :  { %596 = vmatprep.subr.bf16.mxu0 %v750_v0 }
  0x75   :  { %598 = vmatpush3.bf16.msra.mxu0 %v597_v59 }
  0x76   :  { %599 = vmatprep.subr.bf16.mxu0 %v750_v0 }
  0x79   :  { %601 = vmatpush3.bf16.msra.mxu0 %v600_v62 }
  0x7a   :  { %602 = vmatprep.subr.bf16.mxu0 %v750_v0 }
  0x7d   :  { %604 = vmatpush3.bf16.msra.mxu0 %v603_v2 }
  0x7e   :  { %605 = vmatprep.subr.bf16.mxu0 %v750_v0 }
  0x81   :  { %607 = vmatpush3.bf16.msra.mxu0 %v606_v5 }
  0x82   :  { %608 = vmatprep.subr.bf16.mxu0 %v750_v0 }
  0x85   :  { %610 = vmatpush3.bf16.msra.mxu0 %v609_v13 }
  0x86   :  { %611 = vmatprep.subr.bf16.mxu0 %v750_v0 }
  0x89   :  { %613 = vmatpush3.bf16.msra.mxu0 %v612_v16 }
 0x13f   :  { %v170_v7 = vpop.f32.mrb[0].mxu0 }
 0x140   :  { %v171_v8 = vadd.f32 %v383_v6, %v170_v7  ;;  %v471_v9 = vpop.f32.mrb[1].mxu0 }
 0x142   :  { %v174_v10 = vmax.f32 %v171_v8, 0.0 }
 0x144   :  { %505 = vmatmul.mubr.f32.vlgmr.msra.gmra.mrb[0].mxu1 %v174_v10 }
 0x217   :  { %v264_v18 = vpop.f32.mrb[0].mxu1 }
 0x218   :  { %v265_v19 = vadd.f32 %v384_v17, %v264_v18  ;;  %v506_v20 = vpop.f32.mrb[1].mxu1 }
 0x21a   :  { %v268_v21 = vmax.f32 %v265_v19, 0.0 }
 0x21c   :  { %v269_v22 = vadd.f32 %v268_v21, %v174_v10 }
 0x21e   :  { %540 = vmatmul.mubr.f32.vlgmr.msra.gmra.mrb[2].mxu0 %v269_v22 }
 0x2f1   :  { %v359_v24 = vpop.f32.mrb[2].mxu0 }
 0x2f2   :  { %v360_v0 = vadd.f32 %v385_v23, %v359_v24  ;;  %v541_v25 = vpop.f32.mrb[3].mxu0 }
 0x2f4   :  { %624 = vtanh.f32 %v360_v0 }
 0x2fe   :  { %v625_v26 = vpop.eup %624 }
 0x2ff   :  { %v364_v27 = vmul.f32 2.0, %v625_v26 }
 0x301   :  { %365 = vst [vmem:[#allocation10] sm:$0xff] %v364_v27 }
 0x302   :  { %725 = shalt.err (!%p722_p8)
}
 0x303   :  { %s726_s6 = scalar_lea.hbm %s909_s7, 128 }
 0x304   :  { %p727_p9 = scmp.ne.s32.totalorder %s909_s7, %s726_s6  ;;  %p730_p10 = scmp.lt.u32.totalorder %s726_s6, %s909_s7 }
 0x306   :  { %p732_p11 = pnand %p730_p10, %p727_p9 }
 0x308   :  { %735 = shalt.err (!%p732_p11)
}
 0x309   :  { %375 = dma.vmem_to_hbm [thread:$0]  %s373_s29, 128, %s909_s7, [#allocation4]  }
 0x30a   :  { %742 = dma.done.wait [#allocation4], 128  }
 0x30b   :  { %743 = vsyncadd [#allocation4], 4294967168 }
 0x30c   :  { %379 = vsyncpa [#allocation3], 1 }
 0x30d   :  { %380 = vsyncpa [#allocation6], 1 }
 0x30e   :  { %381 = vsyncpa [#allocation9], 1 }
 0x30f   :  { %382 = vsyncpa [#allocation4], 1 }

</bundles_post_ra>
